<compile_context>
chip_gen: v7x
topology: tpu7x:2x2x1
jax: 0.10.0
libtpu: 0.0.40
codegen_flags: <defaults>
</compile_context>

<pallas_src>
import jax
import jax.numpy as jnp
from jax.experimental import pallas as pl
from jax.experimental.pallas import tpu as pltpu


def embedding_add_kernel(idx_ref, table_ref, x_ref, o_ref):
    # idx_ref   : (TS, 1) int32    sequence tile of indices
    # table_ref : (V,  H) float32  full embedding table (VMEM resident, loaded once)
    # x_ref     : (TS, H) float32  (batch-1 dim squeezed by BlockSpec)
    # o_ref     : (TS, H) float32
    idx = idx_ref[...]                                     # (TS, 1)
    ts = idx.shape[0]
    vocab = table_ref.shape[0]

    # One-hot row selector in bf16 (0/1 are exact in bf16).
    iota = jax.lax.broadcasted_iota(jnp.int32, (ts, vocab), dimension=1)
    onehot = (iota == idx).astype(jnp.bfloat16)            # (TS, V)

    # Split the f32 table into bf16 hi/lo halves -> two bf16 MXU passes with f32
    # accumulation.  The one-hot selects exactly one row per output, so each pass
    # reproduces its bf16 half exactly; hi+lo recovers the f32 row to ~2^-18
    # relative error.
    t = table_ref[...]                                     # (V, H) f32
    t_hi = t.astype(jnp.bfloat16)
    t_lo = (t - t_hi.astype(jnp.float32)).astype(jnp.bfloat16)
    emb = (jnp.dot(onehot, t_hi, preferred_element_type=jnp.float32)
           + jnp.dot(onehot, t_lo, preferred_element_type=jnp.float32))  # (TS, H)

    o_ref[...] = x_ref[...] + emb


def embedding_add(x, table, idx, *, seq_tile=128):
    """out[b, s, :] = x[b, s, :] + table[idx[s], :]   (b == 1)."""
    B, S, H = x.shape
    V, Ht = table.shape
    assert Ht == H and B == 1, "module uses batch-1 x and a [V, H] table"

    # Full-table-in-VMEM design: fine for V=512 (1.5 MB) on v5e/v6e (128 MiB VMEM)
    # and v7x (64 MiB/TC).  Fence off larger vocabularies.
    # TODO(synk): add a vocab-tiled variant (grid axis over V marked 'arbitrary',
    # accumulate emb with pl.when init/finalize) before reusing with big vocabs.
    assert V * H * 4 <= 8 * 1024 * 1024, (
        "vocab too large for the full-table-in-VMEM one-hot design")

    # Tile the sequence so the grid has several steps (384 -> 3 tiles of 128):
    # enables DMA/compute overlap and lets v7x split tiles across its 2 cores.
    seq_tile = min(seq_tile, S)
    if S % seq_tile != 0:          # fall back to a single tile for odd sizes
        seq_tile = S

    idx2d = idx.reshape(S, 1).astype(jnp.int32)
    grid = (S // seq_tile,)

    return pl.pallas_call(
        embedding_add_kernel,
        out_shape=jax.ShapeDtypeStruct((B, S, H), x.dtype),
        grid_spec=pltpu.PrefetchScalarGridSpec(
            num_scalar_prefetch=0,
            grid=grid,
            in_specs=[
                # indices tile
                pl.BlockSpec((seq_tile, 1), lambda i: (i, 0)),
                # full embedding table; constant index_map -> fetched once
                pl.BlockSpec((V, H), lambda i: (0, 0)),
                # x tile, batch-1 dim squeezed -> kernel sees (seq_tile, H)
                pl.BlockSpec((pl.Squeezed(), seq_tile, H), lambda i: (0, i, 0)),
            ],
            out_specs=pl.BlockSpec((pl.Squeezed(), seq_tile, H),
                                   lambda i: (0, i, 0)),
        ),
        compiler_params=pltpu.CompilerParams(
            dimension_semantics=("parallel",)),
    )(idx2d, table, x)


if __name__ == "__main__":
    # Small shapes consistent with the module's forward:
    # original B=1, S=384, H=768, vocab=512  ->  here B=1, S=8, H=32, vocab=16
    B, S, H, V = 1, 8, 32, 16

    key = jax.random.PRNGKey(0)
    kx, kt, ki = jax.random.split(key, 3)

    x = jax.random.normal(kx, (B, S, H), dtype=jnp.float32)      # x23
    table = jax.random.normal(kt, (V, H), dtype=jnp.float32)     # embedding2.weight
    idx = jax.random.randint(ki, (S,), 0, V, dtype=jnp.int32)    # _tensor_constant10

    out = jax.block_until_ready(embedding_add(x, table, idx))

    # Reference in plain JAX.  The bf16 hi/lo gather reconstructs the f32 rows
    # to <= ~2^-18 relative error, hence the slightly relaxed atol.
    ref = x + table[idx][None, :, :]
    assert out.shape == (B, S, H)
    assert jnp.allclose(out, ref, atol=5e-5, rtol=1e-5), "mismatch vs reference"

    print("KERNEL_OK")
</pallas_src>

<mosaic_0001>
module attributes {stable_mosaic.version = 11 : i64} {
  func.func @embedding_add_kernel(%arg0: i32, %arg1: memref<8x1xi32, #tpu.memory_space<vmem>>, %arg2: memref<16x32xf32, #tpu.memory_space<vmem>>, %arg3: memref<1x8x32xf32, #tpu.memory_space<vmem>>, %arg4: memref<1x8x32xf32, #tpu.memory_space<vmem>>) attributes {dimension_semantics = [#tpu.dimension_semantics<parallel>], iteration_bounds = array<i64: 1>, scalar_prefetch = 0 : i64, scratch_operands = 0 : i64, tpu.core_type = #tpu.core_type<tc>, window_params = [{transform_indices = @transform_0, window_bounds = array<i64: 8, 1>}, {pipeline_mode = #tpu.pipeline_mode<synchronous>, transform_indices = @transform_1, window_bounds = array<i64: 16, 32>}, {transform_indices = @transform_2, window_bounds = array<i64: 1, 8, 32>}, {transform_indices = @transform_3, window_bounds = array<i64: 1, 8, 32>}]} {
    %c0 = arith.constant 0 : index
    %c0_0 = arith.constant 0 : index
    %0 = vector.load %arg1[%c0, %c0_0] : memref<8x1xi32, #tpu.memory_space<vmem>>, vector<8x1xi32>
    %1 = tpu.iota {dimensions = array<i32: 1>} : vector<8x16xi32>
    %2 = vector.broadcast %0 : vector<8x1xi32> to vector<8x16xi32>
    %3 = arith.cmpi eq, %1, %2 : vector<8x16xi32>
    %4 = arith.extui %3 : vector<8x16xi1> to vector<8x16xi32>
    %5 = arith.sitofp %4 : vector<8x16xi32> to vector<8x16xf32>
    %6 = arith.truncf %5 : vector<8x16xf32> to vector<8x16xbf16>
    %c0_1 = arith.constant 0 : index
    %c0_2 = arith.constant 0 : index
    %7 = vector.load %arg2[%c0_1, %c0_2] : memref<16x32xf32, #tpu.memory_space<vmem>>, vector<16x32xf32>
    %8 = arith.truncf %7 : vector<16x32xf32> to vector<16x32xbf16>
    %9 = arith.extf %8 : vector<16x32xbf16> to vector<16x32xf32>
    %10 = arith.subf %7, %9 : vector<16x32xf32>
    %11 = arith.truncf %10 : vector<16x32xf32> to vector<16x32xbf16>
    %cst = arith.constant dense<0.000000e+00> : vector<8x32xf32>
    %12 = tpu.matmul %6, %8, %cst {dimension_numbers = #tpu.dot_dimension_numbers<[1], [0], [0], [1], [0, 0, 1, 1], [], []>} : vector<8x16xbf16>, vector<16x32xbf16>, vector<8x32xf32> -> vector<8x32xf32>
    %cst_3 = arith.constant dense<0.000000e+00> : vector<8x32xf32>
    %13 = tpu.matmul %6, %11, %cst_3 {dimension_numbers = #tpu.dot_dimension_numbers<[1], [0], [0], [1], [0, 0, 1, 1], [], []>} : vector<8x16xbf16>, vector<16x32xbf16>, vector<8x32xf32> -> vector<8x32xf32>
    %14 = arith.addf %12, %13 : vector<8x32xf32>
    %c0_4 = arith.constant 0 : index
    %c0_5 = arith.constant 0 : index
    %c0_6 = arith.constant 0 : index
    %15 = vector.load %arg3[%c0_4, %c0_5, %c0_6] : memref<1x8x32xf32, #tpu.memory_space<vmem>>, vector<1x8x32xf32>
    %16 = vector.shape_cast %15 : vector<1x8x32xf32> to vector<8x32xf32>
    %17 = arith.addf %16, %14 : vector<8x32xf32>
    %c0_7 = arith.constant 0 : index
    %c0_8 = arith.constant 0 : index
    %c0_9 = arith.constant 0 : index
    %18 = vector.load %arg4[%c0_7, %c0_8, %c0_9] : memref<1x8x32xf32, #tpu.memory_space<vmem>>, vector<1x8x32xf32>
    %19 = vector.shape_cast %18 : vector<1x8x32xf32> to vector<8x32xf32>
    %20 = vector.shape_cast %17 : vector<8x32xf32> to vector<1x8x32xf32>
    tpu.vector_store %arg4[%c0_7, %c0_8, %c0_9], %20 {strides = array<i32>} : memref<1x8x32xf32, #tpu.memory_space<vmem>>, vector<1x8x32xf32>,
    return
  }
  func.func @transform_0(%arg0: i32) -> (i32, i32) {
    %c0_i32 = arith.constant 0 : i32
    %c0_i32_0 = arith.constant 0 : i32
    return %arg0, %c0_i32 : i32, i32
  }
  func.func @transform_1(%arg0: i32) -> (i32, i32) {
    %c0_i32 = arith.constant 0 : i32
    %c0_i32_0 = arith.constant 0 : i32
    %c0_i32_1 = arith.constant 0 : i32
    return %c0_i32, %c0_i32_0 : i32, i32
  }
  func.func @transform_2(%arg0: i32) -> (i32, i32, i32) {
    %c0_i32 = arith.constant 0 : i32
    %c0_i32_0 = arith.constant 0 : i32
    %c0_i32_1 = arith.constant 0 : i32
    return %c0_i32, %arg0, %c0_i32_0 : i32, i32, i32
  }
  func.func @transform_3(%arg0: i32) -> (i32, i32, i32) {
    %c0_i32 = arith.constant 0 : i32
    %c0_i32_0 = arith.constant 0 : i32
    %c0_i32_1 = arith.constant 0 : i32
    return %c0_i32, %arg0, %c0_i32_0 : i32, i32, i32
  }
}

</mosaic_0001>

<bundles_post_ra>
// kernel: tpu_custom_call.1
= control target key start
LH: loop header
LB: loop body
LE: loop exit
PB: predicated region body
PF: predicated region fallthrough
CT: control target
= control target key end

     0   :  { %8 = vsyncpa [#allocation3], 0  ;;  %s283_s0 = inlined_call_operand.vmem [shape: s32[8,1], index: 0, kind: input, shape index: {}]   ;;  %s284_s1 = inlined_call_operand.hbm [shape: f32[16,32], index: 1, kind: input, shape index: {}]   ;;  %s285_s2 = inlined_call_operand.vmem [shape: f32[1,8,32], index: 2, kind: input, shape index: {}]   ;;  %s286_s3 = inlined_call_operand.hbm [shape: f32[1,8,32], index: 3, kind: output, shape index: {}]  }
   0x1   :  { %9 = vsyncpa [#allocation4], 0  ;;  %s226_s12 = smov [#allocation2]   ;;  %s178_s16 = scalar_lea.hbm %s284_s1, 256 }
   0x2   :  { %s17_s13 = sshll.u32 %s226_s12, 4  ;;  %p179_p0 = scmp.ne.s32.totalorder %s284_s1, %s178_s16  ;;  %s18_s13 = int_to_ptr.vmem [resolvable:$true] %s17_s13 }
   0x3   :  { %p182_p1 = scmp.lt.u32.totalorder %s178_s16, %s284_s1 }
   0x5   :  { %p184_p2 = pnand %p182_p1, %p179_p0 }
   0x7   :  { %187 = shalt.err (!%p184_p2)
}
   0x8   :  { %s188_s21 = scalar_lea.vmem %s18_s13, 256  ;;  %p193_p4 = scmp.lt.s32.totalorder %s18_s13, %s18_s13 }
   0x9   :  { %p189_p3 = scmp.ne.s32.totalorder %s18_s13, %s188_s21  ;;  %p194_p5 = scmp.lt.s32.totalorder %s188_s21, %s188_s21 }
   0xb   :  { %p195_p6 = por %p194_p5, %p193_p4 }
   0xd   :  { %p196_p7 = pnand %p195_p6, %p189_p3 }
   0xf   :  { %199 = shalt.err (!%p196_p7)
}
  0x10   :  { %s227_s22 = smov 128   ;;  %s228_s23 = smov 8  }
  0x11   :  { %23 = dma.hbm_to_vmem [thread:$0]  %s284_s1, 256, %s18_s13, [#allocation3], %s227_s22, %s227_s22, %s228_s23  }
  0x12   :  { %222 = dma.done.wait [#allocation3], 256  }
  0x13   :  { %223 = vsyncadd [#allocation3], 4294967040  ;;  %v229_v0 = vmov 0   ;;  %v230_v1 = vmov 0.0   ;;  %v30_v2 = vld [vmem:[%s283_s0] sm:$0xff]  ;;  %v40_v3 = vld [vmem:[#allocation2] sm:$0xff]  ;;  %v31_v11 = vlaneseq }
  0x14   :  { %177 = vset.pattern.permute.xlu0 %v229_v0  ;;  %158 = vmatprep.subr.bf16.mxu0 %v230_v1  ;;  %v41_v4 = vld [vmem:[#allocation2 + $0x8] sm:$0xff]  ;;  %vm231_vm0 = vmmov 0   ;;  %vm48_vm2 = vcmask 130048   ;;  %v132_v18 = vld [vmem:[%s285_s2] sm:$0xff]  ;;  %s232_s28 = smov [#allocation5]   ;;  %vm134_vm3 = vcmask 261120  }
  0x15   :  { %164 = vmatprep.subr.bf16.mxu1 %v230_v1  ;;  %34 = vperm.xlu0 %177, %v30_v2   ;;  %v42_v5 = vpack.c.bf16 %v41_v4, %v40_v3  ;;  %v32_v12 = vand.u32 127, %v31_v11  ;;  %s142_s29 = sshll.u32 %s232_s28, 4  ;;  %s143_s29 = int_to_ptr.vmem [resolvable:$true] %s142_s29 }
  0x16   :  { %160 = vmatprep.mubr.msk.bf16.mxu0 %vm231_vm0, %v230_v1  ;;  %166 = vmatprep.mubr.msk.bf16.mxu1 %vm231_vm0, %v230_v1  ;;  %s200_s30 = scalar_lea.vmem %s143_s29, 128  ;;  %p205_p9 = scmp.lt.s32.totalorder %s143_s29, %s143_s29 }
  0x17   :  { %v43_v6 = vunpack.c.l.bf16 %v42_v5  ;;  %v44_v7 = vunpack.c.h.bf16 %v42_v5  ;;  %165 = vmatpush3.bf16.msra.mxu1 %v42_v5  ;;  %p201_p8 = scmp.ne.s32.totalorder %s143_s29, %s200_s30  ;;  %p206_p10 = scmp.lt.s32.totalorder %s200_s30, %s200_s30 }
  0x19   :  { %v45_v8 = vsub.f32 %v40_v3, %v43_v6  ;;  %v46_v9 = vsub.f32 %v41_v4, %v44_v7  ;;  %p207_p11 = por %p206_p10, %p205_p9 }
  0x1b   :  { %v47_v10 = vpack.c.bf16 %v46_v9, %v45_v8  ;;  %p208_p12 = pnand %p207_p11, %p201_p8 }
  0x1d   :  { %159 = vmatpush3.bf16.msra.mxu0 %v47_v10 }
  0x94   :  { %v35_v13 = vpop.permute.xlu0 %34 }
  0x95   :  { %vm36_vm1 = vcmp.eq.s32.totalorder %v32_v12, %v35_v13 }
  0x96   :  { %v151_v14 = vsel %vm36_vm1, 1.0, %v230_v1 }
  0x97   :  { %v39_v15 = vpack.c.bf16 %v151_v14, %v151_v14 }
  0x99   :  { %161 = vmatmul.mubr.msk.bf16.vlgmr.msra.gmra.mrb[0].mxu0 %vm48_vm2, %v39_v15  ;;  %167 = vmatmul.mubr.msk.bf16.vlgmr.msra.gmra.mrb[0].mxu1 %vm48_vm2, %v39_v15 }
 0x16c   :  { %v86_v16 = vpop.f32.mrb[0].mxu0  ;;  %v126_v17 = vpop.f32.mrb[0].mxu1 }
 0x16d   :  { %v127_v19 = vadd.f32 %v126_v17, %v86_v16  ;;  %v162_v20 = vpop.f32.mrb[1].mxu0  ;;  %v168_v21 = vpop.f32.mrb[1].mxu1 }
 0x16e   :  { %v89_v22 = vpop.f32.mrb[2].mxu0  ;;  %v129_v23 = vpop.f32.mrb[2].mxu1 }
 0x16f   :  { %v133_v24 = vadd.f32 %v132_v18, %v127_v19  ;;  %v163_v25 = vpop.f32.mrb[3].mxu0  ;;  %v169_v26 = vpop.f32.mrb[3].mxu1 }
 0x171   :  { %135 = vst.msk [vmem:[#allocation5] sm:$0xff] %vm134_vm3, %v133_v24 }
 0x172   :  { %211 = shalt.err (!%p208_p12)
}
 0x173   :  { %s212_s5 = scalar_lea.hbm %s286_s3, 128 }
 0x174   :  { %p213_p13 = scmp.ne.s32.totalorder %s286_s3, %s212_s5  ;;  %p216_p0 = scmp.lt.u32.totalorder %s212_s5, %s286_s3 }
 0x176   :  { %p218_p1 = pnand %p216_p0, %p213_p13 }
 0x178   :  { %221 = shalt.err (!%p218_p1)
}
 0x179   :  { %145 = dma.vmem_to_hbm [thread:$0]  %s143_s29, 128, %s286_s3, [#allocation4]  }
 0x17a   :  { %224 = dma.done.wait [#allocation4], 128  }
 0x17b   :  { %225 = vsyncadd [#allocation4], 4294967168 }
 0x17c   :  { %149 = vsyncpa [#allocation3], 1 }
 0x17d   :  { %150 = vsyncpa [#allocation4], 1 }

</bundles_post_ra>
